<compile_context>
chip_gen: v7x
topology: tpu7x:2x2x1
jax: 0.10.0
libtpu: 0.0.40
codegen_flags: <defaults>
</compile_context>

<pallas_src>
import functools

import jax
import jax.numpy as jnp
from jax import lax
from jax.experimental import pallas as pl
from jax.experimental.pallas import tpu as pltpu


def _kl_loss_kernel(pred_ref, label_ref, out_ref, *, batch, batch_tile, mask_rows):
    pred = pred_ref[...].astype(jnp.float32)
    lab = label_ref[...].astype(jnp.float32) * 10.0

    # log_softmax(prediction, axis=1)
    pmax = jnp.max(pred, axis=1, keepdims=True)
    pshift = pred - pmax
    p_logz = jnp.log(jnp.sum(jnp.exp(pshift), axis=1, keepdims=True))
    log_p1 = pshift - p_logz

    # softmax(label*10, axis=1), factored so there is one divide per row instead of C:
    #   sum_c p2*(log p2 - log p1) = sum_c lexp*(lshift - log(lsum) - log p1) / lsum
    # lexp underflowing to 0 reproduces PyTorch's "term == 0 where target == 0" rule
    # (0 * finite = 0; lshift stays finite so there is never a 0 * inf).
    lmax = jnp.max(lab, axis=1, keepdims=True)
    lshift = lab - lmax
    lexp = jnp.exp(lshift)
    lsum = jnp.sum(lexp, axis=1, keepdims=True)
    log_lsum = jnp.log(lsum)

    row_term = jnp.sum(lexp * (lshift - log_lsum - log_p1), axis=1, keepdims=True)
    row_kl = row_term / lsum                       # (TB, 1): one divide per row

    if mask_rows:
        # Boundary block of a ragged batch: rows past B hold undefined VMEM contents.
        # All math above is strictly per-row, so it suffices to select them out here
        # (jnp.where is a select -- NaN/inf in the discarded branch cannot leak through).
        row0 = pl.program_id(0) * batch_tile
        rows = lax.broadcasted_iota(jnp.int32, row_kl.shape, 0) + row0
        row_kl = jnp.where(rows < batch, row_kl, 0.0)

    partial = jnp.sum(row_kl)                      # scalar partial sum for this batch tile
    out_ref[...] = jnp.full(out_ref.shape, partial, dtype=jnp.float32)  # lane-dense store


def _choose_batch_tile(B, C, itemsize):
    """Largest batch tile keeping double-buffered inputs under ~16 MiB of VMEM."""
    align = max(8, 32 // itemsize)                 # sublane alignment for the input dtype
    budget_bytes = 16 * 1024 * 1024
    per_row_bytes = 2 * 2 * C * itemsize           # 2 inputs x 2 pipeline buffers
    tb = budget_bytes // max(per_row_bytes, 1)
    tb = max(align, min(int(tb), 2048))
    tb = (tb // align) * align
    # Never use a tile larger than the (aligned-down) batch, so the boundary block stays
    # the common "partial last tile" case.
    b_floor = max(align, (B // align) * align)
    return int(min(tb, b_floor))


def kl_loss(prediction, label, *, batch_tile=None):
    """prediction, label: [B, C] arrays (f32 or bf16). Returns scalar float32 loss."""
    assert prediction.shape == label.shape and prediction.ndim == 2
    B, C = prediction.shape
    itemsize = jnp.dtype(prediction.dtype).itemsize
    tb = batch_tile if batch_tile is not None else _choose_batch_tile(B, C, itemsize)

    num_tiles = pl.cdiv(B, tb)
    mask_rows = (num_tiles * tb) != B              # static: mask code only when ragged

    kernel = functools.partial(
        _kl_loss_kernel, batch=B, batch_tile=tb, mask_rows=mask_rows)

    partials = pl.pallas_call(
        kernel,
        out_shape=jax.ShapeDtypeStruct((num_tiles, 128), jnp.float32),
        grid_spec=pltpu.PrefetchScalarGridSpec(
            num_scalar_prefetch=0,
            grid=(num_tiles,),
            in_specs=[
                pl.BlockSpec((tb, C), lambda i: (i, 0)),
                pl.BlockSpec((tb, C), lambda i: (i, 0)),
            ],
            out_specs=pl.BlockSpec((1, 128), lambda i: (i, 0)),
        ),
        compiler_params=pltpu.CompilerParams(
            dimension_semantics=("parallel",),      # megacore-shardable on v7x
            vmem_limit_bytes=32 * 1024 * 1024,
        ),
    )(prediction, label)

    # loss = mean over (B*C) elements * B = global_sum / C  (no B*C in f32 -> no 2^24 issue)
    return jnp.sum(partials[:, 0]) / jnp.float32(C)


def _kl_loss_ref(prediction, label):
    """Pure-JAX reference for sanity checking."""
    logits = prediction.astype(jnp.float32)
    tgt_logits = label.astype(jnp.float32) * 10.0
    log_p1 = jax.nn.log_softmax(logits, axis=1)
    p2 = jax.nn.softmax(tgt_logits, axis=1)
    log_p2 = jax.nn.log_softmax(tgt_logits, axis=1)
    pointwise = jnp.where(p2 > 0.0, p2 * (log_p2 - log_p1), 0.0)
    return jnp.mean(pointwise) * prediction.shape[0]


if __name__ == "__main__":
    key = jax.random.PRNGKey(0)
    k1, k2, k3, k4 = jax.random.split(key, 4)

    # Case 1: aligned batch, auto tile size (single tile at this small shape).
    B, C = 16, 128
    pred = jax.random.normal(k1, (B, C), dtype=jnp.float32)
    lab = jax.random.normal(k2, (B, C), dtype=jnp.float32)
    out = jax.block_until_ready(kl_loss(pred, lab))
    ref = jax.block_until_ready(_kl_loss_ref(pred, lab))
    assert jnp.allclose(out, ref, rtol=1e-5, atol=1e-5), (out, ref)

    # Case 2: force multiple batch tiles (exercises parallel grid + wrapper reduce).
    out2 = jax.block_until_ready(kl_loss(pred, lab, batch_tile=8))
    assert jnp.allclose(out2, ref, rtol=1e-5, atol=1e-5), (out2, ref)

    # Case 3: ragged batch (exercises the in-kernel boundary-row masking path).
    Br = 12
    pred_r = jax.random.normal(k3, (Br, C), dtype=jnp.float32)
    lab_r = jax.random.normal(k4, (Br, C), dtype=jnp.float32)
    out3 = jax.block_until_ready(kl_loss(pred_r, lab_r, batch_tile=8))
    ref3 = jax.block_until_ready(_kl_loss_ref(pred_r, lab_r))
    assert jnp.allclose(out3, ref3, rtol=1e-5, atol=1e-5), (out3, ref3)

    print("KERNEL_OK")
</pallas_src>

<mosaic_0001>
module attributes {stable_mosaic.version = 11 : i64} {
  func.func @_kl_loss_kernel(%arg0: i32, %arg1: memref<16x128xf32, #tpu.memory_space<vmem>>, %arg2: memref<16x128xf32, #tpu.memory_space<vmem>>, %arg3: memref<1x128xf32, #tpu.memory_space<vmem>>) attributes {dimension_semantics = [#tpu.dimension_semantics<parallel>], iteration_bounds = array<i64: 1>, scalar_prefetch = 0 : i64, scratch_operands = 0 : i64, tpu.core_type = #tpu.core_type<tc>, window_params = [{transform_indices = @transform_0, window_bounds = array<i64: 16, 128>}, {transform_indices = @transform_1, window_bounds = array<i64: 16, 128>}, {transform_indices = @transform_2, window_bounds = array<i64: 1, 128>}]} {
    %c0 = arith.constant 0 : index
    %c0_0 = arith.constant 0 : index
    %0 = vector.load %arg1[%c0, %c0_0] : memref<16x128xf32, #tpu.memory_space<vmem>>, vector<16x128xf32>
    %c0_1 = arith.constant 0 : index
    %c0_2 = arith.constant 0 : index
    %1 = vector.load %arg2[%c0_1, %c0_2] : memref<16x128xf32, #tpu.memory_space<vmem>>, vector<16x128xf32>
    %cst = arith.constant 1.000000e+01 : f32
    %2 = vector.broadcast %cst : f32 to vector<16x128xf32>
    %3 = arith.mulf %1, %2 : vector<16x128xf32>
    %cst_3 = arith.constant dense<0xFF800000> : vector<16xf32>
    %4 = vector.multi_reduction <maximumf>, %0, %cst_3 [1] : vector<16x128xf32> to vector<16xf32>
    %5 = vector.shape_cast %4 : vector<16xf32> to vector<16x1xf32>
    %6 = vector.broadcast %5 : vector<16x1xf32> to vector<16x128xf32>
    %7 = arith.subf %0, %6 : vector<16x128xf32>
    %8 = math.exp %7 : vector<16x128xf32>
    %cst_4 = arith.constant dense<0.000000e+00> : vector<16xf32>
    %9 = vector.multi_reduction <add>, %8, %cst_4 [1] : vector<16x128xf32> to vector<16xf32>
    %10 = vector.shape_cast %9 : vector<16xf32> to vector<16x1xf32>
    %11 = math.log %10 : vector<16x1xf32>
    %12 = vector.broadcast %11 : vector<16x1xf32> to vector<16x128xf32>
    %13 = arith.subf %7, %12 : vector<16x128xf32>
    %cst_5 = arith.constant dense<0xFF800000> : vector<16xf32>
    %14 = vector.multi_reduction <maximumf>, %3, %cst_5 [1] : vector<16x128xf32> to vector<16xf32>
    %15 = vector.shape_cast %14 : vector<16xf32> to vector<16x1xf32>
    %16 = vector.broadcast %15 : vector<16x1xf32> to vector<16x128xf32>
    %17 = arith.subf %3, %16 : vector<16x128xf32>
    %18 = math.exp %17 : vector<16x128xf32>
    %cst_6 = arith.constant dense<0.000000e+00> : vector<16xf32>
    %19 = vector.multi_reduction <add>, %18, %cst_6 [1] : vector<16x128xf32> to vector<16xf32>
    %20 = vector.shape_cast %19 : vector<16xf32> to vector<16x1xf32>
    %21 = math.log %20 : vector<16x1xf32>
    %22 = vector.broadcast %21 : vector<16x1xf32> to vector<16x128xf32>
    %23 = arith.subf %17, %22 : vector<16x128xf32>
    %24 = arith.subf %23, %13 : vector<16x128xf32>
    %25 = arith.mulf %18, %24 : vector<16x128xf32>
    %cst_7 = arith.constant dense<0.000000e+00> : vector<16xf32>
    %26 = vector.multi_reduction <add>, %25, %cst_7 [1] : vector<16x128xf32> to vector<16xf32>
    %27 = vector.shape_cast %26 : vector<16xf32> to vector<16x1xf32>
    %28 = arith.divf %27, %20 : vector<16x1xf32>
    %29 = vector.shape_cast %28 : vector<16x1xf32> to vector<1x16x1xf32>
    %cst_8 = arith.constant dense<0.000000e+00> : vector<1xf32>
    %30 = vector.multi_reduction <add>, %29, %cst_8 [1, 2] : vector<1x16x1xf32> to vector<1xf32>
    %31 = vector.shape_cast %30 : vector<1xf32> to vector<1x1x1xf32>
    %32 = vector.extract %31[0, 0, 0] : f32 from vector<1x1x1xf32>
    %33 = vector.broadcast %32 : f32 to vector<1x128xf32>
    %c0_9 = arith.constant 0 : index
    %c0_10 = arith.constant 0 : index
    %34 = vector.load %arg3[%c0_9, %c0_10] : memref<1x128xf32, #tpu.memory_space<vmem>>, vector<1x128xf32>
    tpu.vector_store %arg3[%c0_9, %c0_10], %33 {strides = array<i32>} : memref<1x128xf32, #tpu.memory_space<vmem>>, vector<1x128xf32>,
    return
  }
  func.func @transform_0(%arg0: i32) -> (i32, i32) {
    %c0_i32 = arith.constant 0 : i32
    %c0_i32_0 = arith.constant 0 : i32
    return %arg0, %c0_i32 : i32, i32
  }
  func.func @transform_1(%arg0: i32) -> (i32, i32) {
    %c0_i32 = arith.constant 0 : i32
    %c0_i32_0 = arith.constant 0 : i32
    return %arg0, %c0_i32 : i32, i32
  }
  func.func @transform_2(%arg0: i32) -> (i32, i32) {
    %c0_i32 = arith.constant 0 : i32
    %c0_i32_0 = arith.constant 0 : i32
    return %arg0, %c0_i32 : i32, i32
  }
}

</mosaic_0001>

<bundles_post_ra>
// kernel: tpu_custom_call.1
= control target key start
LH: loop header
LB: loop body
LE: loop exit
PB: predicated region body
PF: predicated region fallthrough
CT: control target
= control target key end

     0   :  { %7 = vsyncpa [#allocation3], 0  ;;  %s284_s0 = inlined_call_operand.hbm [shape: f32[16,128], index: 0, kind: input, shape index: {}]   ;;  %s285_s1 = inlined_call_operand.hbm [shape: f32[16,128], index: 1, kind: input, shape index: {}]   ;;  %s286_s2 = inlined_call_operand.hbm [shape: f32[1,128], index: 2, kind: output, shape index: {}]  }
   0x1   :  { %8 = vsyncpa [#allocation6], 0 }
   0x2   :  { %9 = vsyncpa [#allocation4], 0  ;;  %s228_s9 = smov [#allocation2]   ;;  %s156_s13 = scalar_lea.hbm %s284_s0, 256 }
   0x3   :  { %s15_s10 = sshll.u32 %s228_s9, 4  ;;  %p157_p0 = scmp.ne.s32.totalorder %s284_s0, %s156_s13  ;;  %s16_s10 = int_to_ptr.vmem [resolvable:$true] %s15_s10 }
   0x4   :  { %p160_p1 = scmp.lt.u32.totalorder %s156_s13, %s284_s0 }
   0x6   :  { %p162_p2 = pnand %p160_p1, %p157_p0 }
   0x8   :  { %165 = shalt.err (!%p162_p2)
}
   0x9   :  { %s166_s18 = scalar_lea.vmem %s16_s10, 256  ;;  %p171_p4 = scmp.lt.s32.totalorder %s16_s10, %s16_s10 }
   0xa   :  { %p167_p3 = scmp.ne.s32.totalorder %s16_s10, %s166_s18  ;;  %p172_p5 = scmp.lt.s32.totalorder %s166_s18, %s166_s18 }
   0xc   :  { %p173_p6 = por %p172_p5, %p171_p4 }
   0xe   :  { %p174_p7 = pnand %p173_p6, %p167_p3 }
  0x10   :  { %177 = shalt.err (!%p174_p7)
}
  0x11   :  { %s229_s19 = smov 128   ;;  %s230_s20 = smov 8  }
  0x12   :  { %21 = dma.hbm_to_vmem [thread:$0]  %s284_s0, 256, %s16_s10, [#allocation3], %s229_s19, %s229_s19, %s230_s20  }
  0x13   :  { %s231_s23 = smov [#allocation5]   ;;  %s178_s27 = scalar_lea.hbm %s285_s1, 256 }
  0x14   :  { %s27_s24 = sshll.u32 %s231_s23, 4  ;;  %p179_p8 = scmp.ne.s32.totalorder %s285_s1, %s178_s27  ;;  %s28_s24 = int_to_ptr.vmem [resolvable:$true] %s27_s24 }
  0x15   :  { %p182_p9 = scmp.lt.u32.totalorder %s178_s27, %s285_s1 }
  0x17   :  { %p184_p10 = pnand %p182_p9, %p179_p8 }
  0x19   :  { %187 = shalt.err (!%p184_p10)
}
  0x1a   :  { %s188_s4 = scalar_lea.vmem %s28_s24, 256  ;;  %p193_p12 = scmp.lt.s32.totalorder %s28_s24, %s28_s24 }
  0x1b   :  { %p189_p11 = scmp.ne.s32.totalorder %s28_s24, %s188_s4  ;;  %p194_p13 = scmp.lt.s32.totalorder %s188_s4, %s188_s4 }
  0x1d   :  { %p195_p0 = por %p194_p13, %p193_p12 }
  0x1f   :  { %p196_p1 = pnand %p195_p0, %p189_p11 }
  0x21   :  { %199 = shalt.err (!%p196_p1)
}
  0x22   :  { %33 = dma.hbm_to_vmem [thread:$0]  %s285_s1, 256, %s28_s24, [#allocation6], %s229_s19, %s229_s19, %s230_s20  }
  0x23   :  { %222 = dma.done.wait [#allocation3], 256  }
  0x24   :  { %223 = vsyncadd [#allocation3], 4294967040 }
  0x25   :  { %224 = dma.done.wait [#allocation6], 256  }
  0x26   :  { %225 = vsyncadd [#allocation6], 4294967040  ;;  %v40_v0 = vld [vmem:[#allocation2] sm:$0xff]  ;;  %v42_v1 = vld [vmem:[#allocation5] sm:$0xff]  ;;  %vm98_vm0 = vcmask 7168   ;;  %s232_s1 = smov [#allocation7]  }
  0x27   :  { %46 = vmax.xlane.f32.xlu0 %v40_v0  ;;  %v44_v2 = vmul.f32 10.0, %v42_v1  ;;  %v43_v3 = vld [vmem:[#allocation5 + $0x8] sm:$0xff]  ;;  %v41_v4 = vld [vmem:[#allocation2 + $0x8] sm:$0xff]  ;;  %s119_s6 = sshll.u32 %s232_s1, 4  ;;  %s120_s6 = int_to_ptr.vmem [resolvable:$true] %s119_s6 }
  0x28   :  { %v45_v5 = vmul.f32 10.0, %v43_v3  ;;  %s200_s8 = scalar_lea.vmem %s120_s6, 16  ;;  %s204_s9 = scalar_lea.vmem %s120_s6, 32 }
  0x29   :  { %66 = vmax.xlane.f32.xlu1 %v44_v2  ;;  %p201_p2 = scmp.ne.s32.totalorder %s120_s6, %s200_s8  ;;  %p205_p3 = scmp.lt.s32.totalorder %s120_s6, %s120_s6 }
  0x2a   :  { %p206_p4 = scmp.lt.s32.totalorder %s204_s9, %s200_s8 }
  0x2b   :  { %48 = vmax.xlane.f32.xlu0 %v41_v4 }
  0x2c   :  { %p207_p5 = por %p206_p4, %p205_p3 }
  0x2d   :  { %68 = vmax.xlane.f32.xlu1 %v45_v5 }
  0x2e   :  { %p208_p6 = pnand %p207_p5, %p201_p2 }
  0xb4   :  { %v47_v6 = vpop.xlane.xlu0 %46 }
  0xb5   :  { %v50_v7 = vsub.f32 %v40_v0, %v47_v6 }
  0xb6   :  { %v67_v8 = vpop.xlane.xlu1 %66 }
  0xb7   :  { %v52_v9 = vmul.f32 1.442695, %v50_v7  ;;  %v70_v10 = vsub.f32 %v44_v2, %v67_v8 }
  0xb8   :  { %v49_v11 = vpop.xlane.xlu0 %48 }
  0xb9   :  { %136 = vpow2.f32 %v52_v9  ;;  %v72_v12 = vmul.f32 1.442695, %v70_v10  ;;  %v51_v13 = vsub.f32 %v41_v4, %v49_v11 }
  0xba   :  { %v69_v14 = vpop.xlane.xlu1 %68 }
  0xbb   :  { %138 = vpow2.f32 %v72_v12  ;;  %v54_v15 = vmul.f32 1.442695, %v51_v13  ;;  %v71_v16 = vsub.f32 %v45_v5, %v69_v14 }
  0xbd   :  { %140 = vpow2.f32 %v54_v15  ;;  %v74_v17 = vmul.f32 1.442695, %v71_v16 }
  0xbf   :  { %142 = vpow2.f32 %v74_v17 }
  0xc3   :  { %v137_v18 = vpop.eup %136 }
  0xc4   :  { %56 = vadd.xlane.f32.xlu0 %v137_v18 }
  0xc5   :  { %v139_v19 = vpop.eup %138 }
  0xc7   :  { %v141_v20 = vpop.eup %140 }
  0xc8   :  { %76 = vadd.xlane.f32.xlu0 %v139_v19  ;;  %58 = vadd.xlane.f32.xlu1 %v141_v20 }
  0xc9   :  { %v143_v21 = vpop.eup %142 }
  0xcc   :  { %78 = vadd.xlane.f32.xlu1 %v143_v21 }
 0x151   :  { %v57_v22 = vpop.xlane.xlu0 %56 }
 0x152   :  { %144 = vlog2.f32 %v57_v22 }
 0x155   :  { %v59_v23 = vpop.xlane.xlu1 %58  ;;  %v77_v24 = vpop.xlane.xlu0 %76 }
 0x156   :  { %146 = vlog2.f32 %v59_v23 }
 0x157   :  { %148 = vlog2.f32 %v77_v24 }
 0x159   :  { %v79_v25 = vpop.xlane.xlu1 %78 }
 0x15a   :  { %150 = vlog2.f32 %v79_v25 }
 0x15b   :  { %152 = vrcp.f32 %v77_v24 }
 0x15c   :  { %v145_v26 = vpop.eup %144  ;;  %154 = vrcp.f32 %v79_v25 }
 0x15d   :  { %v61_v28 = vmul.f32 0.6931472, %v145_v26 }
 0x15f   :  { %v64_v33 = vsub.f32 %v50_v7, %v61_v28 }
 0x160   :  { %v147_v27 = vpop.eup %146 }
 0x161   :  { %v149_v29 = vpop.eup %148  ;;  %v63_v31 = vmul.f32 0.6931472, %v147_v27 }
 0x162   :  { %v81_v30 = vmul.f32 0.6931472, %v149_v29 }
 0x163   :  { %v65_v37 = vsub.f32 %v51_v13, %v63_v31 }
 0x164   :  { %v151_v32 = vpop.eup %150  ;;  %v84_v34 = vsub.f32 %v70_v10, %v81_v30 }
 0x165   :  { %v83_v35 = vmul.f32 0.6931472, %v151_v32  ;;  %v153_v43 = vpop.eup %152 }
 0x166   :  { %v86_v36 = vsub.f32 %v84_v34, %v64_v33  ;;  %v155_v45 = vpop.eup %154 }
 0x167   :  { %v85_v38 = vsub.f32 %v71_v16, %v83_v35 }
 0x168   :  { %v88_v39 = vmul.f32 %v139_v19, %v86_v36 }
 0x169   :  { %v87_v40 = vsub.f32 %v85_v38, %v65_v37 }
 0x16a   :  { %90 = vadd.xlane.f32.xlu0 %v88_v39 }
 0x16b   :  { %v89_v41 = vmul.f32 %v143_v21, %v87_v40 }
 0x16d   :  { %92 = vadd.xlane.f32.xlu1 %v89_v41 }
 0x1f7   :  { %v91_v42 = vpop.xlane.xlu0 %90 }
 0x1f8   :  { %v95_v44 = vmul.f32 %v153_v43, %v91_v42 }
 0x1fa   :  { %v93_v46 = vpop.xlane.xlu1 %92  ;;  %v99_v48 = vsel %vm98_vm0, %v95_v44, 0.0 }
 0x1fb   :  { %v97_v47 = vmul.f32 %v155_v45, %v93_v46 }
 0x1fd   :  { %v100_v49 = vsel %vm98_vm0, %v97_v47, 0.0 }
 0x1fe   :  { %v101_v50 = vadd.f32 %v100_v49, %v99_v48 }
 0x200   :  { %102 = vadd.xlane.f32.xlu0 %v101_v50 }
 0x28d   :  { %v103_v51 = vpop.xlane.xlu0 %102 }
 0x28e   :  { %v104_v52 = vrot.slane %v103_v51, 4 }
 0x290   :  { %v105_v53 = vadd.f32 %v104_v52, %v103_v51 }
 0x292   :  { %v106_v54 = vrot.slane %v105_v53, 2 }
 0x294   :  { %v107_v55 = vadd.f32 %v106_v54, %v105_v53 }
 0x296   :  { %v108_v56 = vrot.slane %v107_v55, 1 }
 0x298   :  { %v109_v57 = vadd.f32 %v108_v56, %v107_v55 }
 0x29a   :  { %129 = vpush %v109_v57 }
 0x2cb   :  { %s130_s7 = spop %129 }
 0x2cc   :  { %v111_v58 = vstv %s130_s7 }
 0x2cd   :  { %112 = vst [vmem:[#allocation7] sm:$0x1] %v111_v58 }
 0x2ce   :  { %211 = shalt.err (!%p208_p6)
}
 0x2cf   :  { %s212_s12 = scalar_lea.hbm %s286_s2, 16 }
 0x2d0   :  { %p213_p7 = scmp.ne.s32.totalorder %s286_s2, %s212_s12  ;;  %p216_p8 = scmp.lt.u32.totalorder %s212_s12, %s286_s2 }
 0x2d2   :  { %p218_p9 = pnand %p216_p8, %p213_p7 }
 0x2d4   :  { %221 = shalt.err (!%p218_p9)
}
 0x2d5   :  { %122 = dma.vmem_to_hbm [thread:$0]  %s120_s6, 16, %s286_s2, [#allocation4]  }
 0x2d6   :  { %226 = dma.done.wait [#allocation4], 16  }
 0x2d7   :  { %227 = vsyncadd [#allocation4], 4294967280 }
 0x2d8   :  { %126 = vsyncpa [#allocation3], 1 }
 0x2d9   :  { %127 = vsyncpa [#allocation6], 1 }
 0x2da   :  { %128 = vsyncpa [#allocation4], 1 }

</bundles_post_ra>
